<compile_context>
chip_gen: v7x
topology: tpu7x:2x2x1
jax: 0.10.0
libtpu: 0.0.40
codegen_flags: <defaults>
</compile_context>

<pallas_src>
import jax
import jax.numpy as jnp
from jax.experimental import pallas as pl
from jax.experimental.pallas import tpu as pltpu


# ----------------------------------------------------------------------------
# Helpers
# ----------------------------------------------------------------------------
def _round_up(n, m):
    return ((n + m - 1) // m) * m


def _linear_params(key, fan_in, fan_out):
    """PyTorch nn.Linear-style uniform init, stored as (fan_in, fan_out)."""
    kw, kb = jax.random.split(key)
    bound = 1.0 / float(fan_in) ** 0.5
    w = jax.random.uniform(kw, (fan_in, fan_out), jnp.float32, -bound, bound)
    b = jax.random.uniform(kb, (1, fan_out), jnp.float32, -bound, bound)
    return w, b


# ----------------------------------------------------------------------------
# Fused hypernet-heads kernel:  out = relu(x @ W1cat + b1cat) @ W2blk + b2cat
# (W1cat / W2blk are bf16; accumulation is f32; output slab is lane-dense.)
# ----------------------------------------------------------------------------
def _fused_hyper_kernel(x_ref, w1_ref, b1_ref, w2_ref, b2_ref, o_ref):
    # Cast activations to bf16 in-kernel (f32 stays in HBM; one read only).
    x = x_ref[...].astype(jnp.bfloat16)
    # Layer 1: all four heads' first Linears, concatenated along hidden axis.
    h = jnp.dot(x, w1_ref[...], preferred_element_type=jnp.float32)
    h = jnp.maximum(h + b1_ref[...], 0.0)
    # Layer 2: block-diagonal second Linears -> one lane-dense output slab.
    y = jnp.dot(h.astype(w2_ref.dtype), w2_ref[...],
                preferred_element_type=jnp.float32)
    o_ref[...] = (y + b2_ref[...]).astype(o_ref.dtype)


def pallas_hyper_fused(x, w1_cat, b1_cat, w2_blk, b2_cat):
    """Run all four hypernet heads in one pallas_call.

    Returns a (B, OUT_pad) f32 slab; per-head columns are sliced by the caller.
    """
    B, in_dim = x.shape
    h_pad = w1_cat.shape[1]
    out_pad = w2_blk.shape[1]

    # Batch tiling: a single block for small B; 512-row tiles (weights stay
    # resident via constant index_map) + "parallel" semantics when B grows
    # (v7x megacore splits the row tiles across its two TensorCores).
    block_b = min(_round_up(max(B, 1), 8), 512)
    b_pad = _round_up(B, block_b)
    x_in = x
    if b_pad != B:
        x_in = jnp.pad(x_in, ((0, b_pad - B), (0, 0)))
    grid = (b_pad // block_b,)

    out = pl.pallas_call(
        _fused_hyper_kernel,
        out_shape=jax.ShapeDtypeStruct((b_pad, out_pad), jnp.float32),
        grid_spec=pltpu.PrefetchScalarGridSpec(
            num_scalar_prefetch=0,
            grid=grid,
            in_specs=[
                pl.BlockSpec((block_b, in_dim), lambda i: (i, 0)),
                pl.BlockSpec((in_dim, h_pad), lambda i: (0, 0)),
                pl.BlockSpec((1, h_pad), lambda i: (0, 0)),
                pl.BlockSpec((h_pad, out_pad), lambda i: (0, 0)),
                pl.BlockSpec((1, out_pad), lambda i: (0, 0)),
            ],
            out_specs=pl.BlockSpec((block_b, out_pad), lambda i: (i, 0)),
        ),
        compiler_params=pltpu.CompilerParams(
            dimension_semantics=("parallel",)),
    )(x_in, w1_cat, b1_cat, w2_blk, b2_cat)
    return out[:B]


# ----------------------------------------------------------------------------
# Module
# ----------------------------------------------------------------------------
class HyperLayers:
    """JAX/Pallas port of qgroupmix.HyperLayers."""

    def __init__(self, input_dim, hypernet_embed, n_agents, embed_dim, key):
        ks = jax.random.split(key, 8)

        # Per-head f32 parameters (kept for reference / export).
        # head: (first Linear) -> ReLU -> (second Linear)
        self.head_params = {
            "w1": (*_linear_params(ks[0], input_dim, hypernet_embed),
                   *_linear_params(ks[1], hypernet_embed, n_agents * embed_dim)),
            "b1": (*_linear_params(ks[2], input_dim, hypernet_embed),
                   *_linear_params(ks[3], hypernet_embed, embed_dim)),
            "w2": (*_linear_params(ks[4], input_dim, hypernet_embed),
                   *_linear_params(ks[5], hypernet_embed, embed_dim)),
            "b2": (*_linear_params(ks[6], input_dim, embed_dim),
                   *_linear_params(ks[7], embed_dim, 1)),
        }
        order = ("w1", "b1", "w2", "b2")
        hiddens = {"w1": hypernet_embed, "b1": hypernet_embed,
                   "w2": hypernet_embed, "b2": embed_dim}
        outs = {"w1": n_agents * embed_dim, "b1": embed_dim,
                "w2": embed_dim, "b2": 1}

        h_total = sum(hiddens[n] for n in order)             # 224
        o_total = sum(outs[n] for n in order)                # 193
        h_pad = _round_up(h_total, 128)                      # 256 (lane-dense)
        o_pad = _round_up(o_total, 128)                      # 256 (lane-dense)

        w1_cat = jnp.zeros((input_dim, h_pad), jnp.float32)
        b1_cat = jnp.zeros((1, h_pad), jnp.float32)
        w2_blk = jnp.zeros((h_pad, o_pad), jnp.float32)
        b2_cat = jnp.zeros((1, o_pad), jnp.float32)

        self._out_slices = {}
        off_h = off_o = 0
        for name in order:
            w1, b1, w2, b2 = self.head_params[name]
            h, o = hiddens[name], outs[name]
            w1_cat = w1_cat.at[:, off_h:off_h + h].set(w1)
            b1_cat = b1_cat.at[:, off_h:off_h + h].set(b1)
            w2_blk = w2_blk.at[off_h:off_h + h, off_o:off_o + o].set(w2)
            b2_cat = b2_cat.at[:, off_o:off_o + o].set(b2)
            self._out_slices[name] = (off_o, o)
            off_h += h
            off_o += o

        # bf16 weights (native MXU path); f32 biases added post-accumulation.
        self.w1_cat = w1_cat.astype(jnp.bfloat16)
        self.b1_cat = b1_cat
        self.w2_blk = w2_blk.astype(jnp.bfloat16)
        self.b2_cat = b2_cat

    # forward(x): return x  — identity, no kernel, no data movement.
    def forward(self, x):
        return x

    # All four hypernet heads from ONE fused Pallas kernel launch.
    def heads(self, x):
        slab = pallas_hyper_fused(x, self.w1_cat, self.b1_cat,
                                  self.w2_blk, self.b2_cat)
        return {name: slab[:, s:s + n]
                for name, (s, n) in self._out_slices.items()}

    # Per-head accessors (API parity with the PyTorch module's attributes).
    def w1(self, x):
        return self.heads(x)["w1"]

    def b1(self, x):
        return self.heads(x)["b1"]

    def w2(self, x):
        return self.heads(x)["w2"]

    def b2(self, x):
        return self.heads(x)["b2"]


# ----------------------------------------------------------------------------
# Main
# ----------------------------------------------------------------------------
if __name__ == "__main__":
    input_dim, hypernet_embed, n_agents, embed_dim = 32, 64, 4, 32
    batch = 8

    key = jax.random.PRNGKey(0)
    k_x, k_params = jax.random.split(key)
    x = jax.random.normal(k_x, (batch, input_dim), jnp.float32)

    model = HyperLayers(input_dim, hypernet_embed, n_agents, embed_dim,
                        k_params)

    # forward() semantics: identity (zero-copy, per the original module).
    y = model.forward(x)
    assert y.shape == x.shape and y.dtype == x.dtype
    assert bool(jnp.array_equal(y, x)), "forward must be identity"

    # One fused Pallas launch produces all four heads.
    heads = model.heads(x)
    jax.block_until_ready(heads["w1"])

    def ref_mlp(x, params):
        w1, b1, w2, b2 = params
        return jnp.maximum(x @ w1 + b1, 0.0) @ w2 + b2

    expected_dims = {"w1": n_agents * embed_dim, "b1": embed_dim,
                     "w2": embed_dim, "b2": 1}
    for name in ("w1", "b1", "w2", "b2"):
        out = heads[name]
        assert out.shape == (batch, expected_dims[name]), (name, out.shape)
        ref = ref_mlp(x, model.head_params[name])
        # bf16 weights/activations (f32 accumulation) -> loosen tolerance.
        assert bool(jnp.allclose(out, ref, atol=3e-2, rtol=3e-2)), name

    print("KERNEL_OK")
</pallas_src>

<mosaic_0001>
module attributes {stable_mosaic.version = 11 : i64} {
  func.func @_fused_hyper_kernel(%arg0: i32, %arg1: memref<8x32xf32, #tpu.memory_space<vmem>>, %arg2: memref<32x256xbf16, #tpu.memory_space<vmem>>, %arg3: memref<1x256xf32, #tpu.memory_space<vmem>>, %arg4: memref<256x256xbf16, #tpu.memory_space<vmem>>, %arg5: memref<1x256xf32, #tpu.memory_space<vmem>>, %arg6: memref<8x256xf32, #tpu.memory_space<vmem>>) attributes {dimension_semantics = [#tpu.dimension_semantics<parallel>], iteration_bounds = array<i64: 1>, scalar_prefetch = 0 : i64, scratch_operands = 0 : i64, tpu.core_type = #tpu.core_type<tc>, window_params = [{transform_indices = @transform_0, window_bounds = array<i64: 8, 32>}, {pipeline_mode = #tpu.pipeline_mode<synchronous>, transform_indices = @transform_1, window_bounds = array<i64: 32, 256>}, {pipeline_mode = #tpu.pipeline_mode<synchronous>, transform_indices = @transform_2, window_bounds = array<i64: 1, 256>}, {pipeline_mode = #tpu.pipeline_mode<synchronous>, transform_indices = @transform_3, window_bounds = array<i64: 256, 256>}, {pipeline_mode = #tpu.pipeline_mode<synchronous>, transform_indices = @transform_4, window_bounds = array<i64: 1, 256>}, {transform_indices = @transform_5, window_bounds = array<i64: 8, 256>}]} {
    %c0 = arith.constant 0 : index
    %c0_0 = arith.constant 0 : index
    %0 = vector.load %arg1[%c0, %c0_0] : memref<8x32xf32, #tpu.memory_space<vmem>>, vector<8x32xf32>
    %1 = arith.truncf %0 : vector<8x32xf32> to vector<8x32xbf16>
    %c0_1 = arith.constant 0 : index
    %c0_2 = arith.constant 0 : index
    %2 = vector.load %arg2[%c0_1, %c0_2] : memref<32x256xbf16, #tpu.memory_space<vmem>>, vector<32x256xbf16>
    %cst = arith.constant dense<0.000000e+00> : vector<8x256xf32>
    %3 = tpu.matmul %1, %2, %cst {dimension_numbers = #tpu.dot_dimension_numbers<[1], [0], [0], [1], [0, 0, 1, 1], [], []>} : vector<8x32xbf16>, vector<32x256xbf16>, vector<8x256xf32> -> vector<8x256xf32>
    %c0_3 = arith.constant 0 : index
    %c0_4 = arith.constant 0 : index
    %4 = vector.load %arg3[%c0_3, %c0_4] : memref<1x256xf32, #tpu.memory_space<vmem>>, vector<1x256xf32>
    %5 = vector.broadcast %4 : vector<1x256xf32> to vector<8x256xf32>
    %6 = arith.addf %3, %5 : vector<8x256xf32>
    %cst_5 = arith.constant 0.000000e+00 : f32
    %7 = vector.broadcast %cst_5 : f32 to vector<8x256xf32>
    %8 = arith.maximumf %6, %7 : vector<8x256xf32>
    %9 = arith.truncf %8 : vector<8x256xf32> to vector<8x256xbf16>
    %c0_6 = arith.constant 0 : index
    %c0_7 = arith.constant 0 : index
    %10 = vector.load %arg4[%c0_6, %c0_7] : memref<256x256xbf16, #tpu.memory_space<vmem>>, vector<256x256xbf16>
    %cst_8 = arith.constant dense<0.000000e+00> : vector<8x256xf32>
    %11 = tpu.matmul %9, %10, %cst_8 {dimension_numbers = #tpu.dot_dimension_numbers<[1], [0], [0], [1], [0, 0, 1, 1], [], []>} : vector<8x256xbf16>, vector<256x256xbf16>, vector<8x256xf32> -> vector<8x256xf32>
    %c0_9 = arith.constant 0 : index
    %c0_10 = arith.constant 0 : index
    %12 = vector.load %arg5[%c0_9, %c0_10] : memref<1x256xf32, #tpu.memory_space<vmem>>, vector<1x256xf32>
    %13 = vector.broadcast %12 : vector<1x256xf32> to vector<8x256xf32>
    %14 = arith.addf %11, %13 : vector<8x256xf32>
    %c0_11 = arith.constant 0 : index
    %c0_12 = arith.constant 0 : index
    %15 = vector.load %arg6[%c0_11, %c0_12] : memref<8x256xf32, #tpu.memory_space<vmem>>, vector<8x256xf32>
    tpu.vector_store %arg6[%c0_11, %c0_12], %14 {strides = array<i32>} : memref<8x256xf32, #tpu.memory_space<vmem>>, vector<8x256xf32>,
    return
  }
  func.func @transform_0(%arg0: i32) -> (i32, i32) {
    %c0_i32 = arith.constant 0 : i32
    %c0_i32_0 = arith.constant 0 : i32
    return %arg0, %c0_i32 : i32, i32
  }
  func.func @transform_1(%arg0: i32) -> (i32, i32) {
    %c0_i32 = arith.constant 0 : i32
    %c0_i32_0 = arith.constant 0 : i32
    %c0_i32_1 = arith.constant 0 : i32
    return %c0_i32, %c0_i32_0 : i32, i32
  }
  func.func @transform_2(%arg0: i32) -> (i32, i32) {
    %c0_i32 = arith.constant 0 : i32
    %c0_i32_0 = arith.constant 0 : i32
    %c0_i32_1 = arith.constant 0 : i32
    return %c0_i32, %c0_i32_0 : i32, i32
  }
  func.func @transform_3(%arg0: i32) -> (i32, i32) {
    %c0_i32 = arith.constant 0 : i32
    %c0_i32_0 = arith.constant 0 : i32
    %c0_i32_1 = arith.constant 0 : i32
    return %c0_i32, %c0_i32_0 : i32, i32
  }
  func.func @transform_4(%arg0: i32) -> (i32, i32) {
    %c0_i32 = arith.constant 0 : i32
    %c0_i32_0 = arith.constant 0 : i32
    %c0_i32_1 = arith.constant 0 : i32
    return %c0_i32, %c0_i32_0 : i32, i32
  }
  func.func @transform_5(%arg0: i32) -> (i32, i32) {
    %c0_i32 = arith.constant 0 : i32
    %c0_i32_0 = arith.constant 0 : i32
    return %arg0, %c0_i32 : i32, i32
  }
}

</mosaic_0001>

<bundles_post_ra>
// kernel: tpu_custom_call.1
= control target key start
LH: loop header
LB: loop body
LE: loop exit
PB: predicated region body
PF: predicated region fallthrough
CT: control target
= control target key end

     0   :  { %10 = vsyncpa [#allocation3], 0  ;;  %s700_s0 = inlined_call_operand.hbm [shape: f32[8,32], index: 0, kind: input, shape index: {}]   ;;  %s701_s1 = inlined_call_operand.hbm [shape: bf16[32,256], index: 1, kind: input, shape index: {}]   ;;  %s702_s2 = inlined_call_operand.vmem [shape: f32[1,256], index: 2, kind: input, shape index: {}]   ;;  %s703_s3 = inlined_call_operand.hbm [shape: bf16[256,256], index: 3, kind: input, shape index: {}]   ;;  %s704_s4 = inlined_call_operand.vmem [shape: f32[1,256], index: 4, kind: input, shape index: {}]   ;;  %s705_s5 = inlined_call_operand.hbm [shape: f32[8,256], index: 5, kind: output, shape index: {}]  }
   0x1   :  { %11 = vsyncpa [#allocation6], 0 }
   0x2   :  { %12 = vsyncpa [#allocation4], 0  ;;  %s603_s18 = smov [#allocation5]   ;;  %s509_s22 = scalar_lea.hbm %s701_s1, 512 }
   0x3   :  { %s28_s19 = sshll.u32 %s603_s18, 4  ;;  %p510_p0 = scmp.ne.s32.totalorder %s701_s1, %s509_s22  ;;  %s29_s19 = int_to_ptr.vmem [resolvable:$true] %s28_s19 }
   0x4   :  { %p513_p1 = scmp.lt.u32.totalorder %s509_s22, %s701_s1 }
   0x6   :  { %p515_p2 = pnand %p513_p1, %p510_p0 }
   0x8   :  { %518 = shalt.err (!%p515_p2)
}
   0x9   :  { %s519_s27 = scalar_lea.vmem %s29_s19, 512  ;;  %p524_p4 = scmp.lt.s32.totalorder %s29_s19, %s29_s19 }
   0xa   :  { %p520_p3 = scmp.ne.s32.totalorder %s29_s19, %s519_s27  ;;  %p525_p5 = scmp.lt.s32.totalorder %s519_s27, %s519_s27 }
   0xc   :  { %p526_p6 = por %p525_p5, %p524_p4 }
   0xe   :  { %p527_p7 = pnand %p526_p6, %p520_p3 }
  0x10   :  { %530 = shalt.err (!%p527_p7)
}
  0x11   :  { %s604_s28 = smov 128   ;;  %s605_s29 = smov 8  }
  0x12   :  { %34 = dma.hbm_to_vmem [thread:$0]  %s701_s1, 512, %s29_s19, [#allocation6], %s604_s28, %s604_s28, %s605_s29  }
  0x13   :  { %s606_s7 = smov [#allocation2]   ;;  %s607_s9 = smov [#allocation7]  }
  0x14   :  { %s19_s8 = sshll.u32 %s606_s7, 4  ;;  %s42_s10 = sshll.u32 %s607_s9, 4  ;;  %s20_s8 = int_to_ptr.vmem [resolvable:$true] %s19_s8  ;;  %s43_s10 = int_to_ptr.vmem [resolvable:$true] %s42_s10 }
  0x15   :  { %s531_s13 = scalar_lea.hbm %s700_s0, 128 }
  0x16   :  { %p532_p8 = scmp.ne.s32.totalorder %s700_s0, %s531_s13  ;;  %p535_p9 = scmp.lt.u32.totalorder %s531_s13, %s700_s0 }
  0x18   :  { %p537_p10 = pnand %p535_p9, %p532_p8 }
  0x1a   :  { %540 = shalt.err (!%p537_p10)
}
  0x1b   :  { %s541_s1 = scalar_lea.vmem %s20_s8, 128  ;;  %p546_p12 = scmp.lt.s32.totalorder %s20_s8, %s20_s8 }
  0x1c   :  { %p542_p11 = scmp.ne.s32.totalorder %s20_s8, %s541_s1  ;;  %p547_p13 = scmp.lt.s32.totalorder %s541_s1, %s541_s1 }
  0x1e   :  { %p548_p0 = por %p547_p13, %p546_p12 }
  0x20   :  { %p549_p1 = pnand %p548_p0, %p542_p11 }
  0x22   :  { %552 = shalt.err (!%p549_p1)
}
  0x23   :  { %22 = dma.hbm_to_vmem [thread:$0]  %s700_s0, 128, %s20_s8, [#allocation3]  }
  0x24   :  { %s553_s22 = scalar_lea.hbm %s703_s3, 4096 }
  0x25   :  { %p554_p2 = scmp.ne.s32.totalorder %s703_s3, %s553_s22  ;;  %p557_p3 = scmp.lt.u32.totalorder %s553_s22, %s703_s3 }
  0x27   :  { %p559_p4 = pnand %p557_p3, %p554_p2 }
  0x29   :  { %562 = shalt.err (!%p559_p4)
}
  0x2a   :  { %s563_s27 = scalar_lea.vmem %s43_s10, 4096  ;;  %p568_p6 = scmp.lt.s32.totalorder %s43_s10, %s43_s10 }
  0x2b   :  { %p564_p5 = scmp.ne.s32.totalorder %s43_s10, %s563_s27  ;;  %p569_p7 = scmp.lt.s32.totalorder %s563_s27, %s563_s27 }
  0x2d   :  { %p570_p8 = por %p569_p7, %p568_p6 }
  0x2f   :  { %p571_p9 = pnand %p570_p8, %p564_p5 }
  0x31   :  { %574 = shalt.err (!%p571_p9)
}
  0x32   :  { %48 = dma.hbm_to_vmem [thread:$0]  %s703_s3, 4096, %s43_s10, [#allocation6], %s604_s28, %s604_s28, %s605_s29  }
  0x33   :  { %597 = dma.done.wait [#allocation3], 128  }
  0x34   :  { %598 = vsyncadd [#allocation3], 4294967168 }
  0x35   :  { %599 = dma.done.wait [#allocation6], 4608  }
  0x36   :  { %600 = vsyncadd [#allocation6], 4294962688  ;;  %v608_v0 = vmov 0   ;;  %v455_v1 = vld [vmem:[#allocation5 + $0x4] ss:$8 sps:$4 sm:$0xff]   ;;  %v61_v5 = vld [vmem:[#allocation2] sm:$0xff]  ;;  %v69_v39 = vlaneseq }
  0x37   :  { %135 = vmatprep.mubr.bf16.mxu0 %v608_v0  ;;  %v457_v2 = vld [vmem:[#allocation5] ss:$8 sps:$4 sm:$0xff]   ;;  %103 = vmatprep.subr.bf16.mxu0 %v455_v1  ;;  %v458_v3 = vld [vmem:[#allocation5 + $0x14] ss:$8 sps:$4 sm:$0xff]   ;;  %v460_v4 = vld [vmem:[#allocation5 + $0x10] ss:$8 sps:$4 sm:$0xff]   ;;  %v62_v9 = vpack.c.bf16 %v61_v5, %v61_v5 }
  0x38   :  { %104 = vmatpush1.bf16.msra.mxu0 %v457_v2  ;;  %v461_v6 = vld [vmem:[#allocation7 + $0x4] ss:$8 sps:$4 sm:$0xff]   ;;  %v463_v7 = vld [vmem:[#allocation7] ss:$8 sps:$4 sm:$0xff]   ;;  %v464_v8 = vld [vmem:[#allocation7 + $0x14] ss:$8 sps:$4 sm:$0xff]  }
  0x39   :  { %105 = vmatprep.subr.bf16.mxu0 %v458_v3  ;;  %352 = vmatprep.subr.bf16.mxu1 %v461_v6  ;;  %v466_v10 = vld [vmem:[#allocation7 + $0x10] ss:$8 sps:$4 sm:$0xff]   ;;  %vm99_vm0 = vcmask 261120   ;;  %v467_v11 = vld [vmem:[#allocation7 + $0x24] ss:$8 sps:$4 sm:$0xff]   ;;  %v70_v40 = vshrl.u32 %v69_v39, 7 }
  0x3a   :  { %353 = vmatpush1.bf16.msra.mxu1 %v463_v7  ;;  %v469_v12 = vld [vmem:[#allocation7 + $0x20] ss:$8 sps:$4 sm:$0xff]   ;;  %v470_v13 = vld [vmem:[#allocation7 + $0x34] ss:$8 sps:$4 sm:$0xff]   ;;  %v472_v14 = vld [vmem:[#allocation7 + $0x30] ss:$8 sps:$4 sm:$0xff]  }
  0x3b   :  { %354 = vmatprep.subr.bf16.mxu1 %v464_v8  ;;  %v473_v15 = vld [vmem:[#allocation7 + $0x44] ss:$8 sps:$4 sm:$0xff]   ;;  %v475_v16 = vld [vmem:[#allocation7 + $0x40] ss:$8 sps:$4 sm:$0xff]   ;;  %v476_v17 = vld [vmem:[#allocation7 + $0x54] ss:$8 sps:$4 sm:$0xff]  }
  0x3c   :  { %106 = vmatpush1.bf16.msra.mxu0 %v460_v4  ;;  %v478_v18 = vld [vmem:[#allocation7 + $0x50] ss:$8 sps:$4 sm:$0xff]   ;;  %v479_v19 = vld [vmem:[#allocation7 + $0x64] ss:$8 sps:$4 sm:$0xff]   ;;  %v481_v20 = vld [vmem:[#allocation7 + $0x60] ss:$8 sps:$4 sm:$0xff]  }
  0x3d   :  { %v482_v21 = vld [vmem:[#allocation7 + $0x74] ss:$8 sps:$4 sm:$0xff]   ;;  %v484_v22 = vld [vmem:[#allocation7 + $0x70] ss:$8 sps:$4 sm:$0xff]   ;;  %v485_v23 = vld [vmem:[#allocation7 + $0x84] ss:$8 sps:$4 sm:$0xff]  }
  0x3e   :  { %355 = vmatpush1.bf16.msra.mxu1 %v466_v10  ;;  %v487_v24 = vld [vmem:[#allocation7 + $0x80] ss:$8 sps:$4 sm:$0xff]   ;;  %v488_v25 = vld [vmem:[#allocation7 + $0x94] ss:$8 sps:$4 sm:$0xff]   ;;  %v490_v26 = vld [vmem:[#allocation7 + $0x90] ss:$8 sps:$4 sm:$0xff]  }
  0x3f   :  { %415 = vmatmul.mubr.msk.bf16.vlgmr.msra.gmra.mrb[0].mxu0 %vm99_vm0, %v62_v9  ;;  %356 = vmatprep.subr.bf16.mxu1 %v467_v11  ;;  %v491_v27 = vld [vmem:[#allocation7 + $0xa4] ss:$8 sps:$4 sm:$0xff]   ;;  %v493_v28 = vld [vmem:[#allocation7 + $0xa0] ss:$8 sps:$4 sm:$0xff]   ;;  %v494_v29 = vld [vmem:[#allocation7 + $0xb4] ss:$8 sps:$4 sm:$0xff]  }
  0x40   :  { %v496_v30 = vld [vmem:[#allocation7 + $0xb0] ss:$8 sps:$4 sm:$0xff]   ;;  %v497_v31 = vld [vmem:[#allocation7 + $0xc4] ss:$8 sps:$4 sm:$0xff]   ;;  %v499_v32 = vld [vmem:[#allocation7 + $0xc0] ss:$8 sps:$4 sm:$0xff]  }
  0x41   :  { %v500_v33 = vld [vmem:[#allocation7 + $0xd4] ss:$8 sps:$4 sm:$0xff]   ;;  %v502_v34 = vld [vmem:[#allocation7 + $0xd0] ss:$8 sps:$4 sm:$0xff]   ;;  %v503_v35 = vld [vmem:[#allocation7 + $0xe4] ss:$8 sps:$4 sm:$0xff]  }
  0x42   :  { %357 = vmatpush1.bf16.msra.mxu1 %v469_v12  ;;  %v505_v36 = vld [vmem:[#allocation7 + $0xe0] ss:$8 sps:$4 sm:$0xff]   ;;  %v506_v37 = vld [vmem:[#allocation7 + $0xf4] ss:$8 sps:$4 sm:$0xff]   ;;  %v508_v38 = vld [vmem:[#allocation7 + $0xf0] ss:$8 sps:$4 sm:$0xff]  }
  0x43   :  { %358 = vmatprep.subr.bf16.mxu1 %v470_v13  ;;  %v71_v41 = vsub.s32 0, %v70_v40  ;;  %v67_v42 = vld [vmem:[%s702_s2] sm:$0x3]  ;;  %v75_v43 = vsub.s32 1, %v70_v40  ;;  %s609_s2 = smov [#allocation8]  }
  0x44   :  { %v180_v56 = vld [vmem:[%s704_s4] sm:$0x3]  ;;  %s401_s7 = sshll.u32 %s609_s2, 4  ;;  %s402_s7 = int_to_ptr.vmem [resolvable:$true] %s401_s7 }
  0x45   :  { %v72_v44 = vrot.slane %v67_v42, %v71_v41  ;;  %v76_v45 = vrot.slane %v67_v42, %v75_v43  ;;  %v185_v57 = vrot.slane %v180_v56, %v71_v41  ;;  %v189_v58 = vrot.slane %v180_v56, %v75_v43  ;;  %s575_s8 = scalar_lea.vmem %s402_s7, 256  ;;  %p580_p11 = scmp.lt.s32.totalorder %s402_s7, %s402_s7 }
  0x46   :  { %359 = vmatpush1.bf16.msra.mxu1 %v472_v14  ;;  %p576_p10 = scmp.ne.s32.totalorder %s402_s7, %s575_s8  ;;  %p581_p12 = scmp.lt.s32.totalorder %s575_s8, %s575_s8 }
  0x47   :  { %360 = vmatprep.subr.bf16.mxu1 %v473_v15 }
  0x48   :  { %p582_p13 = por %p581_p12, %p580_p11 }
  0x4a   :  { %361 = vmatpush1.bf16.msra.mxu1 %v475_v16  ;;  %p583_p0 = pnand %p582_p13, %p576_p10 }
  0x4b   :  { %362 = vmatprep.subr.bf16.mxu1 %v476_v17 }
  0x4e   :  { %363 = vmatpush1.bf16.msra.mxu1 %v478_v18 }
  0x4f   :  { %364 = vmatprep.subr.bf16.mxu1 %v479_v19 }
  0x52   :  { %365 = vmatpush1.bf16.msra.mxu1 %v481_v20 }
  0x53   :  { %366 = vmatprep.subr.bf16.mxu1 %v482_v21 }
  0x56   :  { %367 = vmatpush1.bf16.msra.mxu1 %v484_v22 }
  0x57   :  { %368 = vmatprep.subr.bf16.mxu1 %v485_v23 }
  0x5a   :  { %369 = vmatpush1.bf16.msra.mxu1 %v487_v24 }
  0x5b   :  { %370 = vmatprep.subr.bf16.mxu1 %v488_v25 }
  0x5e   :  { %371 = vmatpush1.bf16.msra.mxu1 %v490_v26 }
  0x5f   :  { %372 = vmatprep.subr.bf16.mxu1 %v491_v27 }
  0x62   :  { %373 = vmatpush1.bf16.msra.mxu1 %v493_v28 }
  0x63   :  { %374 = vmatprep.subr.bf16.mxu1 %v494_v29 }
  0x66   :  { %375 = vmatpush1.bf16.msra.mxu1 %v496_v30 }
  0x67   :  { %376 = vmatprep.subr.bf16.mxu1 %v497_v31 }
  0x6a   :  { %377 = vmatpush1.bf16.msra.mxu1 %v499_v32 }
  0x6b   :  { %378 = vmatprep.subr.bf16.mxu1 %v500_v33 }
  0x6e   :  { %379 = vmatpush1.bf16.msra.mxu1 %v502_v34 }
  0x6f   :  { %380 = vmatprep.subr.bf16.mxu1 %v503_v35 }
  0x72   :  { %381 = vmatpush1.bf16.msra.mxu1 %v505_v36 }
  0x73   :  { %382 = vmatprep.subr.bf16.mxu1 %v506_v37 }
  0x76   :  { %383 = vmatpush1.bf16.msra.mxu1 %v508_v38 }
 0x112   :  { %v137_v46 = vpop.f32.mrb[0].mxu0 }
 0x113   :  { %v138_v47 = vadd.f32 %v137_v46, %v72_v44  ;;  %v139_v48 = vpop.f32.mrb[1].mxu0 }
 0x114   :  { %v140_v49 = vadd.f32 %v139_v48, %v76_v45  ;;  %v141_v50 = vpop.f32.mrb[2].mxu0 }
 0x115   :  { %v144_v51 = vmax.f32 %v138_v47, 0.0  ;;  %v142_v52 = vpop.f32.mrb[3].mxu0 }
 0x116   :  { %v145_v53 = vmax.f32 %v140_v49, 0.0 }
 0x117   :  { %v146_v55 = vpack.c.bf16 %v144_v51, %v144_v51 }
 0x118   :  { %v147_v54 = vpack.c.bf16 %v145_v53, %v145_v53 }
 0x11a   :  { %384 = vmatprep.mubr.bf16.mxu1 %v147_v54 }
 0x11b   :  { %385 = vmatmul.mubr.bf16.vlgmr.msra.gmra.mrb[0].mxu1 %v146_v55 }
 0x1ee   :  { %v386_v59 = vpop.f32.mrb[0].mxu1 }
 0x1ef   :  { %v387_v60 = vadd.f32 %v386_v59, %v185_v57  ;;  %v388_v61 = vpop.f32.mrb[1].mxu1 }
 0x1f0   :  { %v389_v62 = vadd.f32 %v388_v61, %v189_v58  ;;  %v390_v63 = vpop.f32.mrb[2].mxu1 }
 0x1f1   :  { %393 = vst [vmem:[#allocation8] sm:$0xff] %v387_v60  ;;  %v391_v0 = vpop.f32.mrb[3].mxu1 }
 0x1f2   :  { %394 = vst [vmem:[#allocation8 + $0x8] sm:$0xff] %v389_v62 }
 0x1f3   :  { %586 = shalt.err (!%p583_p0)
}
 0x1f4   :  { %s587_s10 = scalar_lea.hbm %s705_s5, 256 }
 0x1f5   :  { %p588_p1 = scmp.ne.s32.totalorder %s705_s5, %s587_s10  ;;  %p591_p2 = scmp.lt.u32.totalorder %s587_s10, %s705_s5 }
 0x1f7   :  { %p593_p3 = pnand %p591_p2, %p588_p1 }
 0x1f9   :  { %596 = shalt.err (!%p593_p3)
}
 0x1fa   :  { %404 = dma.vmem_to_hbm [thread:$0]  %s402_s7, 256, %s705_s5, [#allocation4]  }
 0x1fb   :  { %601 = dma.done.wait [#allocation4], 256  }
 0x1fc   :  { %602 = vsyncadd [#allocation4], 4294967040 }
 0x1fd   :  { %408 = vsyncpa [#allocation3], 1 }
 0x1fe   :  { %409 = vsyncpa [#allocation6], 1 }
 0x1ff   :  { %410 = vsyncpa [#allocation4], 1 }

</bundles_post_ra>
